<compile_context>
chip_gen: v6e
topology: v6e:2x2x1
jax: 0.10.0
libtpu: 0.0.40
codegen_flags: <defaults>
</compile_context>

<pallas_src>
import functools

import numpy as np

import jax
import jax.numpy as jnp
from jax import lax
from jax.experimental import pallas as pl
from jax.experimental.pallas import tpu as pltpu


def _round_up(v, m):
    return (v + m - 1) // m * m


def _elu(x):
    # F.elu with alpha=1.0:  x if x > 0 else exp(x) - 1
    return jnp.where(x > 0, x, jnp.exp(x) - 1.0)


def _fixup_kernel(scal_ref, mask_ref, x_ref, w1_ref, w2_ref, o_ref, *, W):
    # scal_ref : SMEM (4,)                [bias1a, bias1b, bias2a, bias2b]
    #                                     (`scale` is baked into w2_ref)
    # mask_ref : VMEM (8, L)              border masks for the 8 non-center taps
    # x_ref    : VMEM (Cin_p, L)          input; L = images_per_step * H * W
    # w1_ref   : VMEM (Cout_p, 9*Cin_p)   conv1 weights, taps flattened into K
    # w2_ref   : VMEM (Cout, 9*Cout_p + Cin_p)   [scale*conv2 | 1x1 shortcut]
    # o_ref    : VMEM (Cout, L)           lane-dense output
    L = x_ref.shape[1]

    bias1a = scal_ref[0]
    bias1b = scal_ref[1]
    bias2a = scal_ref[2]
    bias2b = scal_ref[3]

    x = x_ref[...]                                   # (Cin_p, L) f32
    masks = mask_ref[...]                            # (8, L)     f32 0/1

    def im2col(act):
        # 9-tap im2col via XLU lane rolls + precomputed border masks.  Rolls
        # never leak across images in the lane-folded batch because the masks
        # are per-image (any pull that crosses an image border / row edge is
        # exactly an out-of-bounds tap and is zeroed).
        pieces = []
        m = 0
        for dh in (-1, 0, 1):
            for dw in (-1, 0, 1):
                if dh == 0 and dw == 0:
                    pieces.append(act)               # center tap, no mask
                else:
                    off = dh * W + dw
                    shifted = pltpu.roll(act, shift=(-off) % L, axis=1)
                    pieces.append(shifted * masks[m:m + 1, :])
                    m += 1
        return jnp.concatenate(pieces, axis=0)       # (9*C, L)

    # conv1: one MXU matmul with K = 9*Cin_p.
    act1 = _elu(x) + bias1a
    h1 = jnp.dot(w1_ref[...], im2col(act1),
                 preferred_element_type=jnp.float32) + bias1b   # (Cout_p, L)

    # conv2 fused with the 1x1 shortcut: x is appended as a 10th "tap" group;
    # `scale` was pre-multiplied into the conv2 columns of w2_ref host-side.
    act2 = _elu(h1) + bias2a
    patches2 = jnp.concatenate([im2col(act2), x], axis=0)  # (9*Cout_p+Cin_p, L)
    out = jnp.dot(w2_ref[...], patches2,
                  preferred_element_type=jnp.float32) + bias2b

    o_ref[...] = out.astype(o_ref.dtype)             # single unmasked store


def prepare_fixup_params(w1_oihw, w2_oihw, ws_oihw, scalars):
    """One-time parameter prep (hoisted out of the per-call forward path).

    Returns (w1m, w2aug, kernel_scalars):
      w1m   : (Cout_p, 9*Cin_p)          conv1 weights, tap-major / channel-minor
      w2aug : (Cout, 9*Cout_p + Cin_p)   [scale * conv2 | 1x1 shortcut]
      kernel_scalars : (4,) f32          [bias1a, bias1b, bias2a, bias2b]
    """
    scalars = jnp.asarray(scalars, jnp.float32)
    bias1a, bias1b, bias2a, scale, bias2b = (scalars[i] for i in range(5))

    Cout, Cin = w1_oihw.shape[:2]
    Cin_p = _round_up(Cin, 8)
    Cout_p = _round_up(Cout, 8)

    w1p = jnp.pad(w1_oihw.astype(jnp.float32),
                  ((0, Cout_p - Cout), (0, Cin_p - Cin), (0, 0), (0, 0)))
    w1m = jnp.transpose(w1p, (0, 2, 3, 1)).reshape(Cout_p, 9 * Cin_p)

    w2p = jnp.pad(w2_oihw.astype(jnp.float32),
                  ((0, 0), (0, Cout_p - Cout), (0, 0), (0, 0)))
    w2m = jnp.transpose(w2p, (0, 2, 3, 1)).reshape(Cout, 9 * Cout_p)

    if ws_oihw is None:          # identity shortcut (in == out, stride == 1)
        wsm = jnp.eye(Cout, Cin_p, dtype=jnp.float32)
    else:
        wsm = jnp.pad(ws_oihw[:, :, 0, 0].astype(jnp.float32),
                      ((0, 0), (0, Cin_p - Cin)))

    w2aug = jnp.concatenate([scale * w2m, wsm], axis=1)
    kernel_scalars = jnp.stack([bias1a, bias1b, bias2a, bias2b])
    return (jax.device_put(w1m), jax.device_put(w2aug),
            jax.device_put(kernel_scalars))


def _border_masks(H, W, images_per_step):
    """Per-image border masks for the 8 non-center taps (trace-time constant)."""
    HW = H * W
    pos = np.arange(images_per_step * HW)
    local = pos % HW
    r, c = local // W, local % W
    rows = []
    for dh in (-1, 0, 1):
        for dw in (-1, 0, 1):
            if dh == 0 and dw == 0:
                continue
            valid = ((r + dh >= 0) & (r + dh < H) &
                     (c + dw >= 0) & (c + dw < W))
            rows.append(valid.astype(np.float32))
    return jnp.asarray(np.stack(rows))               # (8, images_per_step*HW)


@functools.partial(jax.jit, static_argnames=("num_chunks",))
def fixup_res_unit_forward(x_nchw, w1m, w2aug, kscal, *, num_chunks=1):
    """FixupResUnit forward (stride=1).  x: NCHW; params from prepare_fixup_params."""
    N, Cin, H, W = x_nchw.shape
    HW = H * W
    Cout_p, K1 = w1m.shape
    Cin_p = K1 // 9
    Cout = w2aug.shape[0]

    assert N % num_chunks == 0, "num_chunks must divide the batch size"
    images_per_step = N // num_chunks
    L = images_per_step * HW
    if L % 128 != 0 and num_chunks != 1:
        # keep blocks full-extent when the lane width is not a 128 multiple
        num_chunks, images_per_step, L = 1, N, N * HW

    # Lane-folded layout: channels on sublanes, image-major (N*H*W) on lanes.
    x_flat = x_nchw.reshape(N, Cin, HW).astype(jnp.float32)
    if Cin_p != Cin:
        x_flat = jnp.pad(x_flat, ((0, 0), (0, Cin_p - Cin), (0, 0)))
    x_cl = jnp.transpose(x_flat, (1, 0, 2)).reshape(Cin_p, N * HW)

    masks = _border_masks(H, W, images_per_step)

    kernel = functools.partial(_fixup_kernel, W=W)
    out_cl = pl.pallas_call(
        kernel,
        out_shape=jax.ShapeDtypeStruct((Cout, N * HW), jnp.float32),
        grid=(num_chunks,),
        in_specs=[
            pl.BlockSpec(memory_space=pltpu.MemorySpace.SMEM),      # scalars
            pl.BlockSpec(masks.shape, lambda n: (0, 0)),            # masks
            pl.BlockSpec((Cin_p, L), lambda n: (0, n)),             # x
            pl.BlockSpec(w1m.shape, lambda n: (0, 0)),              # conv1 w
            pl.BlockSpec(w2aug.shape, lambda n: (0, 0)),            # conv2|sc w
        ],
        out_specs=pl.BlockSpec((Cout, L), lambda n: (0, n)),
        compiler_params=pltpu.CompilerParams(
            dimension_semantics=("parallel",)),   # megacore-shardable on v7x
    )(kscal, masks, x_cl, w1m, w2aug)

    return jnp.transpose(out_cl.reshape(Cout, N, HW),
                         (1, 0, 2)).reshape(N, Cout, H, W)


def _default_num_chunks(n):
    # Single grid step (whole batch folded onto lanes) on single-TC v5e/v6e;
    # keep a 2-way "parallel" grid on dual-TC v7x so both TensorCores get work.
    try:
        kind = jax.devices()[0].device_kind.lower()
    except Exception:
        kind = ""
    cores = 2 if "v7" in kind else 1
    c = max(1, min(n, cores))
    while n % c:
        c -= 1
    return c


def reference_forward(x_nchw, w1_oihw, w2_oihw, ws_oihw, scalars):
    """Pure-JAX reference replicating the PyTorch forward (NCHW / OIHW)."""
    b1a, b1b, b2a, scale, b2b = [scalars[i] for i in range(5)]
    dn = ("NCHW", "OIHW", "NCHW")
    o = _elu(x_nchw) + b1a
    o = lax.conv_general_dilated(o, w1_oihw, (1, 1), "SAME",
                                 dimension_numbers=dn)
    o = o + b1b
    o = _elu(o) + b2a
    o = lax.conv_general_dilated(o, w2_oihw, (1, 1), "SAME",
                                 dimension_numbers=dn)
    o = o * scale + b2b
    if ws_oihw is None:
        sc = x_nchw
    else:
        sc = lax.conv_general_dilated(x_nchw, ws_oihw, (1, 1), "SAME",
                                      dimension_numbers=dn)
    return sc + o


if __name__ == "__main__":
    N, Cin, H, W = 2, 4, 16, 16
    Cout = 8  # in != out -> shortcut is a 1x1 conv

    key = jax.random.PRNGKey(0)
    kx, k1, k2, ks = jax.random.split(key, 4)

    x = jax.random.normal(kx, (N, Cin, H, W), jnp.float32)            # NCHW
    w1 = jax.random.normal(k1, (Cout, Cin, 3, 3), jnp.float32) * 0.1  # OIHW
    w2 = jax.random.normal(k2, (Cout, Cout, 3, 3), jnp.float32) * 0.1
    w_sc = jax.random.normal(ks, (Cout, Cin, 1, 1), jnp.float32) * 0.1

    # Fixup scalar params [bias1a, bias1b, bias2a, scale, bias2b].
    # (Module __init__ uses zeros/ones; nonzero values here so every
    #  bias/scale path is actually exercised by the check.)
    scalars = jnp.array([0.10, -0.05, 0.20, 0.90, 0.03], jnp.float32)

    params = prepare_fixup_params(w1, w2, w_sc, scalars)   # one-time prep
    num_chunks = _default_num_chunks(N)

    out = fixup_res_unit_forward(x, *params, num_chunks=num_chunks)
    out = jax.block_until_ready(out)

    ref = reference_forward(x, w1, w2, w_sc, scalars)
    assert out.shape == (N, Cout, H, W)
    err = float(jnp.max(jnp.abs(out - ref)))
    assert jnp.allclose(out, ref, atol=1e-4, rtol=1e-4), err

    print("KERNEL_OK")
</pallas_src>

<mosaic_0001>
module attributes {stable_mosaic.version = 11 : i64} {
  func.func @_fixup_kernel(%arg0: i32, %arg1: memref<4xf32, #tpu.memory_space<smem>>, %arg2: memref<8x512xf32, #tpu.memory_space<vmem>>, %arg3: memref<8x512xf32, #tpu.memory_space<vmem>>, %arg4: memref<8x72xf32, #tpu.memory_space<vmem>>, %arg5: memref<8x80xf32, #tpu.memory_space<vmem>>, %arg6: memref<8x512xf32, #tpu.memory_space<vmem>>) attributes {dimension_semantics = [#tpu.dimension_semantics<parallel>], iteration_bounds = array<i64: 1>, scalar_prefetch = 0 : i64, scratch_operands = 0 : i64, tpu.core_type = #tpu.core_type<tc>, window_params = [{transform_indices = @transform_0, window_bounds = array<i64: 4>}, {pipeline_mode = #tpu.pipeline_mode<synchronous>, transform_indices = @transform_1, window_bounds = array<i64: 8, 512>}, {transform_indices = @transform_2, window_bounds = array<i64: 8, 512>}, {pipeline_mode = #tpu.pipeline_mode<synchronous>, transform_indices = @transform_3, window_bounds = array<i64: 8, 72>}, {pipeline_mode = #tpu.pipeline_mode<synchronous>, transform_indices = @transform_4, window_bounds = array<i64: 8, 80>}, {transform_indices = @transform_5, window_bounds = array<i64: 8, 512>}]} {
    %c0 = arith.constant 0 : index
    %0 = memref.load %arg1[%c0] : memref<4xf32, #tpu.memory_space<smem>>
    %c1 = arith.constant 1 : index
    %1 = memref.load %arg1[%c1] : memref<4xf32, #tpu.memory_space<smem>>
    %c2 = arith.constant 2 : index
    %2 = memref.load %arg1[%c2] : memref<4xf32, #tpu.memory_space<smem>>
    %c3 = arith.constant 3 : index
    %3 = memref.load %arg1[%c3] : memref<4xf32, #tpu.memory_space<smem>>
    %c0_0 = arith.constant 0 : index
    %c0_1 = arith.constant 0 : index
    %4 = vector.load %arg3[%c0_0, %c0_1] : memref<8x512xf32, #tpu.memory_space<vmem>>, vector<8x512xf32>
    %c0_2 = arith.constant 0 : index
    %c0_3 = arith.constant 0 : index
    %5 = vector.load %arg2[%c0_2, %c0_3] : memref<8x512xf32, #tpu.memory_space<vmem>>, vector<8x512xf32>
    %cst = arith.constant 0.000000e+00 : f32
    %6 = vector.broadcast %cst : f32 to vector<8x512xf32>
    %7 = arith.cmpf ogt, %4, %6 : vector<8x512xf32>
    %8 = math.exp %4 : vector<8x512xf32>
    %cst_4 = arith.constant 1.000000e+00 : f32
    %9 = vector.broadcast %cst_4 : f32 to vector<8x512xf32>
    %10 = arith.subf %8, %9 : vector<8x512xf32>
    %11 = arith.select %7, %4, %10 : vector<8x512xi1>, vector<8x512xf32>
    %12 = vector.broadcast %0 : f32 to vector<8x512xf32>
    %13 = arith.addf %11, %12 : vector<8x512xf32>
    %c0_5 = arith.constant 0 : index
    %c0_6 = arith.constant 0 : index
    %14 = vector.load %arg4[%c0_5, %c0_6] : memref<8x72xf32, #tpu.memory_space<vmem>>, vector<8x72xf32>
    %c17_i32 = arith.constant 17 : i32
    %15 = tpu.dynamic_rotate %13 by %c17_i32 dim 1 : vector<8x512xf32>, i32 -> vector<8x512xf32>
    %16 = vector.extract_strided_slice %5 {offsets = [0, 0], sizes = [1, 512], strides = [1, 1]} : vector<8x512xf32> to vector<1x512xf32>
    %17 = vector.broadcast %16 : vector<1x512xf32> to vector<8x512xf32>
    %18 = arith.mulf %15, %17 : vector<8x512xf32>
    %c16_i32 = arith.constant 16 : i32
    %19 = tpu.dynamic_rotate %13 by %c16_i32 dim 1 : vector<8x512xf32>, i32 -> vector<8x512xf32>
    %20 = vector.extract_strided_slice %5 {offsets = [1, 0], sizes = [1, 512], strides = [1, 1]} : vector<8x512xf32> to vector<1x512xf32>
    %21 = vector.broadcast %20 : vector<1x512xf32> to vector<8x512xf32>
    %22 = arith.mulf %19, %21 : vector<8x512xf32>
    %c15_i32 = arith.constant 15 : i32
    %23 = tpu.dynamic_rotate %13 by %c15_i32 dim 1 : vector<8x512xf32>, i32 -> vector<8x512xf32>
    %24 = vector.extract_strided_slice %5 {offsets = [2, 0], sizes = [1, 512], strides = [1, 1]} : vector<8x512xf32> to vector<1x512xf32>
    %25 = vector.broadcast %24 : vector<1x512xf32> to vector<8x512xf32>
    %26 = arith.mulf %23, %25 : vector<8x512xf32>
    %c1_i32 = arith.constant 1 : i32
    %27 = tpu.dynamic_rotate %13 by %c1_i32 dim 1 : vector<8x512xf32>, i32 -> vector<8x512xf32>
    %28 = vector.extract_strided_slice %5 {offsets = [3, 0], sizes = [1, 512], strides = [1, 1]} : vector<8x512xf32> to vector<1x512xf32>
    %29 = vector.broadcast %28 : vector<1x512xf32> to vector<8x512xf32>
    %30 = arith.mulf %27, %29 : vector<8x512xf32>
    %c511_i32 = arith.constant 511 : i32
    %31 = tpu.dynamic_rotate %13 by %c511_i32 dim 1 : vector<8x512xf32>, i32 -> vector<8x512xf32>
    %32 = vector.extract_strided_slice %5 {offsets = [4, 0], sizes = [1, 512], strides = [1, 1]} : vector<8x512xf32> to vector<1x512xf32>
    %33 = vector.broadcast %32 : vector<1x512xf32> to vector<8x512xf32>
    %34 = arith.mulf %31, %33 : vector<8x512xf32>
    %c497_i32 = arith.constant 497 : i32
    %35 = tpu.dynamic_rotate %13 by %c497_i32 dim 1 : vector<8x512xf32>, i32 -> vector<8x512xf32>
    %36 = vector.extract_strided_slice %5 {offsets = [5, 0], sizes = [1, 512], strides = [1, 1]} : vector<8x512xf32> to vector<1x512xf32>
    %37 = vector.broadcast %36 : vector<1x512xf32> to vector<8x512xf32>
    %38 = arith.mulf %35, %37 : vector<8x512xf32>
    %c496_i32 = arith.constant 496 : i32
    %39 = tpu.dynamic_rotate %13 by %c496_i32 dim 1 : vector<8x512xf32>, i32 -> vector<8x512xf32>
    %40 = vector.extract_strided_slice %5 {offsets = [6, 0], sizes = [1, 512], strides = [1, 1]} : vector<8x512xf32> to vector<1x512xf32>
    %41 = vector.broadcast %40 : vector<1x512xf32> to vector<8x512xf32>
    %42 = arith.mulf %39, %41 : vector<8x512xf32>
    %c495_i32 = arith.constant 495 : i32
    %43 = tpu.dynamic_rotate %13 by %c495_i32 dim 1 : vector<8x512xf32>, i32 -> vector<8x512xf32>
    %44 = vector.extract_strided_slice %5 {offsets = [7, 0], sizes = [1, 512], strides = [1, 1]} : vector<8x512xf32> to vector<1x512xf32>
    %45 = vector.broadcast %44 : vector<1x512xf32> to vector<8x512xf32>
    %46 = arith.mulf %43, %45 : vector<8x512xf32>
    %47 = tpu.concatenate %18, %22, %26, %30, %13, %34, %38, %42, %46 in 0 : vector<8x512xf32>, vector<8x512xf32>, vector<8x512xf32>, vector<8x512xf32>, vector<8x512xf32>, vector<8x512xf32>, vector<8x512xf32>, vector<8x512xf32>, vector<8x512xf32> -> vector<72x512xf32>
    %cst_7 = arith.constant dense<0.000000e+00> : vector<8x512xf32>
    %48 = tpu.matmul %14, %47, %cst_7 {dimension_numbers = #tpu.dot_dimension_numbers<[1], [0], [0], [1], [0, 0, 1, 1], [], []>} : vector<8x72xf32>, vector<72x512xf32>, vector<8x512xf32> -> vector<8x512xf32>
    %49 = vector.broadcast %1 : f32 to vector<8x512xf32>
    %50 = arith.addf %48, %49 : vector<8x512xf32>
    %cst_8 = arith.constant 0.000000e+00 : f32
    %51 = vector.broadcast %cst_8 : f32 to vector<8x512xf32>
    %52 = arith.cmpf ogt, %50, %51 : vector<8x512xf32>
    %53 = math.exp %50 : vector<8x512xf32>
    %cst_9 = arith.constant 1.000000e+00 : f32
    %54 = vector.broadcast %cst_9 : f32 to vector<8x512xf32>
    %55 = arith.subf %53, %54 : vector<8x512xf32>
    %56 = arith.select %52, %50, %55 : vector<8x512xi1>, vector<8x512xf32>
    %57 = vector.broadcast %2 : f32 to vector<8x512xf32>
    %58 = arith.addf %56, %57 : vector<8x512xf32>
    %c17_i32_10 = arith.constant 17 : i32
    %59 = tpu.dynamic_rotate %58 by %c17_i32_10 dim 1 : vector<8x512xf32>, i32 -> vector<8x512xf32>
    %60 = vector.extract_strided_slice %5 {offsets = [0, 0], sizes = [1, 512], strides = [1, 1]} : vector<8x512xf32> to vector<1x512xf32>
    %61 = vector.broadcast %60 : vector<1x512xf32> to vector<8x512xf32>
    %62 = arith.mulf %59, %61 : vector<8x512xf32>
    %c16_i32_11 = arith.constant 16 : i32
    %63 = tpu.dynamic_rotate %58 by %c16_i32_11 dim 1 : vector<8x512xf32>, i32 -> vector<8x512xf32>
    %64 = vector.extract_strided_slice %5 {offsets = [1, 0], sizes = [1, 512], strides = [1, 1]} : vector<8x512xf32> to vector<1x512xf32>
    %65 = vector.broadcast %64 : vector<1x512xf32> to vector<8x512xf32>
    %66 = arith.mulf %63, %65 : vector<8x512xf32>
    %c15_i32_12 = arith.constant 15 : i32
    %67 = tpu.dynamic_rotate %58 by %c15_i32_12 dim 1 : vector<8x512xf32>, i32 -> vector<8x512xf32>
    %68 = vector.extract_strided_slice %5 {offsets = [2, 0], sizes = [1, 512], strides = [1, 1]} : vector<8x512xf32> to vector<1x512xf32>
    %69 = vector.broadcast %68 : vector<1x512xf32> to vector<8x512xf32>
    %70 = arith.mulf %67, %69 : vector<8x512xf32>
    %c1_i32_13 = arith.constant 1 : i32
    %71 = tpu.dynamic_rotate %58 by %c1_i32_13 dim 1 : vector<8x512xf32>, i32 -> vector<8x512xf32>
    %72 = vector.extract_strided_slice %5 {offsets = [3, 0], sizes = [1, 512], strides = [1, 1]} : vector<8x512xf32> to vector<1x512xf32>
    %73 = vector.broadcast %72 : vector<1x512xf32> to vector<8x512xf32>
    %74 = arith.mulf %71, %73 : vector<8x512xf32>
    %c511_i32_14 = arith.constant 511 : i32
    %75 = tpu.dynamic_rotate %58 by %c511_i32_14 dim 1 : vector<8x512xf32>, i32 -> vector<8x512xf32>
    %76 = vector.extract_strided_slice %5 {offsets = [4, 0], sizes = [1, 512], strides = [1, 1]} : vector<8x512xf32> to vector<1x512xf32>
    %77 = vector.broadcast %76 : vector<1x512xf32> to vector<8x512xf32>
    %78 = arith.mulf %75, %77 : vector<8x512xf32>
    %c497_i32_15 = arith.constant 497 : i32
    %79 = tpu.dynamic_rotate %58 by %c497_i32_15 dim 1 : vector<8x512xf32>, i32 -> vector<8x512xf32>
    %80 = vector.extract_strided_slice %5 {offsets = [5, 0], sizes = [1, 512], strides = [1, 1]} : vector<8x512xf32> to vector<1x512xf32>
    %81 = vector.broadcast %80 : vector<1x512xf32> to vector<8x512xf32>
    %82 = arith.mulf %79, %81 : vector<8x512xf32>
    %c496_i32_16 = arith.constant 496 : i32
    %83 = tpu.dynamic_rotate %58 by %c496_i32_16 dim 1 : vector<8x512xf32>, i32 -> vector<8x512xf32>
    %84 = vector.extract_strided_slice %5 {offsets = [6, 0], sizes = [1, 512], strides = [1, 1]} : vector<8x512xf32> to vector<1x512xf32>
    %85 = vector.broadcast %84 : vector<1x512xf32> to vector<8x512xf32>
    %86 = arith.mulf %83, %85 : vector<8x512xf32>
    %c495_i32_17 = arith.constant 495 : i32
    %87 = tpu.dynamic_rotate %58 by %c495_i32_17 dim 1 : vector<8x512xf32>, i32 -> vector<8x512xf32>
    %88 = vector.extract_strided_slice %5 {offsets = [7, 0], sizes = [1, 512], strides = [1, 1]} : vector<8x512xf32> to vector<1x512xf32>
    %89 = vector.broadcast %88 : vector<1x512xf32> to vector<8x512xf32>
    %90 = arith.mulf %87, %89 : vector<8x512xf32>
    %91 = tpu.concatenate %62, %66, %70, %74, %58, %78, %82, %86, %90 in 0 : vector<8x512xf32>, vector<8x512xf32>, vector<8x512xf32>, vector<8x512xf32>, vector<8x512xf32>, vector<8x512xf32>, vector<8x512xf32>, vector<8x512xf32>, vector<8x512xf32> -> vector<72x512xf32>
    %92 = tpu.concatenate %91, %4 in 0 : vector<72x512xf32>, vector<8x512xf32> -> vector<80x512xf32>
    %c0_18 = arith.constant 0 : index
    %c0_19 = arith.constant 0 : index
    %93 = vector.load %arg5[%c0_18, %c0_19] : memref<8x80xf32, #tpu.memory_space<vmem>>, vector<8x80xf32>
    %cst_20 = arith.constant dense<0.000000e+00> : vector<8x512xf32>
    %94 = tpu.matmul %93, %92, %cst_20 {dimension_numbers = #tpu.dot_dimension_numbers<[1], [0], [0], [1], [0, 0, 1, 1], [], []>} : vector<8x80xf32>, vector<80x512xf32>, vector<8x512xf32> -> vector<8x512xf32>
    %95 = vector.broadcast %3 : f32 to vector<8x512xf32>
    %96 = arith.addf %94, %95 : vector<8x512xf32>
    %c0_21 = arith.constant 0 : index
    %c0_22 = arith.constant 0 : index
    %97 = vector.load %arg6[%c0_21, %c0_22] : memref<8x512xf32, #tpu.memory_space<vmem>>, vector<8x512xf32>
    tpu.vector_store %arg6[%c0_21, %c0_22], %96 {strides = array<i32>} : memref<8x512xf32, #tpu.memory_space<vmem>>, vector<8x512xf32>,
    return
  }
  func.func @transform_0(%arg0: i32) -> i32 {
    %c0_i32 = arith.constant 0 : i32
    %c0_i32_0 = arith.constant 0 : i32
    return %c0_i32 : i32
  }
  func.func @transform_1(%arg0: i32) -> (i32, i32) {
    %c0_i32 = arith.constant 0 : i32
    %c0_i32_0 = arith.constant 0 : i32
    %c0_i32_1 = arith.constant 0 : i32
    return %c0_i32, %c0_i32_0 : i32, i32
  }
  func.func @transform_2(%arg0: i32) -> (i32, i32) {
    %c0_i32 = arith.constant 0 : i32
    %c0_i32_0 = arith.constant 0 : i32
    return %c0_i32, %arg0 : i32, i32
  }
  func.func @transform_3(%arg0: i32) -> (i32, i32) {
    %c0_i32 = arith.constant 0 : i32
    %c0_i32_0 = arith.constant 0 : i32
    %c0_i32_1 = arith.constant 0 : i32
    return %c0_i32, %c0_i32_0 : i32, i32
  }
  func.func @transform_4(%arg0: i32) -> (i32, i32) {
    %c0_i32 = arith.constant 0 : i32
    %c0_i32_0 = arith.constant 0 : i32
    %c0_i32_1 = arith.constant 0 : i32
    return %c0_i32, %c0_i32_0 : i32, i32
  }
  func.func @transform_5(%arg0: i32) -> (i32, i32) {
    %c0_i32 = arith.constant 0 : i32
    %c0_i32_0 = arith.constant 0 : i32
    return %c0_i32, %arg0 : i32, i32
  }
}

</mosaic_0001>

<bundles_post_ra>
// kernel: fixup_res_unit_forward.1
= control target key start
LH: loop header
LB: loop body
LE: loop exit
PB: predicated region body
PF: predicated region fallthrough
CT: control target
= control target key end

     0   :  { %10 = vsyncpa [#allocation3], 0  ;;  %s1430_s0 = inlined_call_operand.vmem [shape: f32[4], index: 0, kind: input, shape index: {}]   ;;  %s1431_s1 = inlined_call_operand.vmem [shape: f32[8,512], index: 1, kind: input, shape index: {}]   ;;  %s1432_s2 = inlined_call_operand.vmem [shape: f32[8,512], index: 2, kind: input, shape index: {}]   ;;  %s1433_s3 = inlined_call_operand.vmem [shape: f32[8,72], index: 3, kind: input, shape index: {}]   ;;  %s1434_s4 = inlined_call_operand.vmem [shape: f32[8,80], index: 4, kind: input, shape index: {}]   ;;  %s1435_s5 = inlined_call_operand.vmem [shape: f32[8,512], index: 5, kind: output, shape index: {}]  }
   0x1   :  { %s17_s20 = sshll.u32 %s1430_s0, 4  ;;  %s18_s20 = int_to_ptr.vmem [resolvable:$true] %s17_s20 }
   0x2   :  { %s835_s21 = scalar_lea.vmem %s18_s20, 16  ;;  %p840_p1 = scmp.lt.s32.totalorder %s18_s20, %s18_s20 }
   0x3   :  { %p836_p0 = scmp.ne.s32.totalorder %s18_s20, %s835_s21  ;;  %p841_p2 = scmp.lt.s32.totalorder %s835_s21, %s835_s21 }
   0x5   :  { %p842_p3 = por %p841_p2, %p840_p1 }
   0x7   :  { %p843_p4 = pnand %p842_p3, %p836_p0 }
   0x9   :  { %846 = shalt.err (!%p843_p4)
}
   0xa   :  { %s849_s22 = smov [#allocation2]  }
   0xb   :  { %20 = dma.vmem_to_smem %s18_s20, 16, %s849_s22, [#allocation3]  }
   0xc   :  { %847 = dma.done.wait [#allocation3], 16  }
   0xd   :  { %848 = vsyncadd [#allocation3], 4294967280 }
   0xe   :  { %32 = sfence }
   0xf   :  { %v895_v0 = vld [vmem:[%s1432_s2 + $0x10] sm:$0xff]  ;;  %v900_v1 = vld [vmem:[%s1432_s2] sm:$0xff]  ;;  %v905_v2 = vld [vmem:[%s1432_s2 + $0x18] sm:$0xff]  ;;  %s33_s30 = sld [smem:[#allocation2]]  ;;  %s851_s6 = smov 112   ;;  %v857_v25 = vmov 0.0   ;;  %v79_v26 = vlaneseq }
  0x10   :  { %v53_v3 = vmul.f32 1.442695, %v895_v0  ;;  %v49_v4 = vmul.f32 1.442695, %v900_v1  ;;  %v55_v5 = vmul.f32 1.442695, %v905_v2  ;;  %406 = vmatprep.mubr.f32.mxu0 %v857_v25  ;;  %477 = vmatprep.mubr.f32.mxu1 %v857_v25 }
  0x11   :  { %v913_v6 = vld [vmem:[%s1432_s2 + $0x8] sm:$0xff]  ;;  %vm47_vm0 = vcmp.gt.f32.partialorder %v895_v0, 0.0  ;;  %vm45_vm1 = vcmp.gt.f32.partialorder %v900_v1, 0.0  ;;  %vm48_vm2 = vcmp.gt.f32.partialorder %v905_v2, 0.0  ;;  %s850_s2 = smov 111   ;;  %s852_s7 = smov 113  }
  0x12   :  { %819 = vpow2.f32 %v53_v3  ;;  %v51_v7 = vmul.f32 1.442695, %v913_v6  ;;  %vm46_vm3 = vcmp.gt.f32.partialorder %v913_v6, 0.0  ;;  %s853_s8 = smov 127   ;;  %s854_s9 = smov 1   ;;  %v998_v27 = vshrl.u32 %v79_v26, 7 }
  0x13   :  { %821 = vpow2.f32 %v49_v4  ;;  %s855_s10 = smov 15   ;;  %s856_s11 = smov 16   ;;  %v1000_v28 = vand.u32 127, %v79_v26  ;;  %v1006_v30 = vld [vmem:[%s1431_s1 + $0x18] sm:$0xff]  ;;  %v1011_v31 = vld [vmem:[%s1431_s1 + $0x10] sm:$0xff]  ;;  %v1016_v33 = vld [vmem:[%s1431_s1 + $0x8] sm:$0xff] }
  0x14   :  { %823 = vpow2.f32 %v55_v5  ;;  %s858_s12 = smov 17   ;;  %v319_v29 = vsub.s32 7, %v998_v27  ;;  %v1021_v34 = vld [vmem:[%s1431_s1] sm:$0xff]  ;;  %v286_v51 = vsub.s32 6, %v998_v27  ;;  %vm338_vm12 = vcmask 588800   ;;  %s795_s22 = sld [smem:[#allocation2 + $0x2]] }
  0x15   :  { %825 = vpow2.f32 %v51_v7  ;;  %v65_v11 = vstv %s33_s30  ;;  %vm312_vm4 = vcmp.lt.s32.totalorder %v1000_v28, 111  ;;  %vm279_vm5 = vcmp.lt.s32.totalorder %v1000_v28, 112  ;;  %s796_s25 = sld [smem:[#allocation2 + $0x3]] }
  0x16   :  { %v1025_v36 = vrot.slane %v1006_v30, %v319_v29  ;;  %v1028_v37 = vrot.slane %v1011_v31, %v319_v29  ;;  %v1031_v38 = vrot.slane %v1016_v33, %v319_v29  ;;  %v1034_v39 = vrot.slane %v1021_v34, %v319_v29 }
  0x17   :  { %v1051_v53 = vrot.slane %v1006_v30, %v286_v51  ;;  %v1054_v54 = vrot.slane %v1016_v33, %v286_v51  ;;  %v1057_v55 = vrot.slane %v1011_v31, %v286_v51  ;;  %v1060_v56 = vrot.slane %v1021_v34, %v286_v51 }
  0x18   :  { %vm246_vm6 = vcmp.lt.s32.totalorder %v1000_v28, 113  ;;  %vm213_vm7 = vcmp.lt.s32.totalorder %v1000_v28, 127  ;;  %vm180_vm8 = vcmp.lt.s32.totalorder %v1000_v28, 1  ;;  %vm147_vm9 = vcmp.lt.s32.totalorder %v1000_v28, 15 }
  0x19   :  { %vm114_vm10 = vcmp.lt.s32.totalorder %v1000_v28, 16  ;;  %vm81_vm11 = vcmp.lt.s32.totalorder %v1000_v28, 17 }
  0x1f   :  { %v820_v8 = vpop.eup %819 }
  0x20   :  { %v822_v9 = vpop.eup %821  ;;  %v799_v10 = vadd.f32 -1.0, %v820_v8  ;;  %v253_v8 = vsub.s32 5, %v998_v27 }
  0x21   :  { %v824_v12 = vpop.eup %823  ;;  %v797_v13 = vadd.f32 -1.0, %v822_v9 }
  0x22   :  { %v826_v14 = vpop.eup %825  ;;  %v63_v15 = vsel %vm47_vm0, %v895_v0, %v799_v10  ;;  %v800_v16 = vadd.f32 -1.0, %v824_v12  ;;  %v1077_v10 = vrot.slane %v1006_v30, %v253_v8  ;;  %v1083_v12 = vrot.slane %v1011_v31, %v253_v8 }
  0x23   :  { %v921_v17 = vadd.f32 %v65_v11, %v63_v15  ;;  %v61_v18 = vsel %vm45_vm1, %v900_v1, %v797_v13  ;;  %v798_v19 = vadd.f32 -1.0, %v826_v14  ;;  %v1086_v13 = vrot.slane %v1021_v34, %v253_v8 }
  0x24   :  { %v924_v20 = vadd.f32 %v65_v11, %v61_v18  ;;  %v64_v21 = vsel %vm48_vm2, %v905_v2, %v800_v16  ;;  %vm639_vm1 = vcmask 654336  }
  0x25   :  { %308 = vrot.lane.b32.xlu1 %v921_v17, %s850_s2  ;;  %v929_v22 = vadd.f32 %v65_v11, %v64_v21  ;;  %v62_v23 = vsel %vm46_vm3, %v913_v6, %v798_v19 }
  0x26   :  { %304 = vrot.lane.b32.xlu0 %v924_v20, %s850_s2  ;;  %v934_v24 = vadd.f32 %v65_v11, %v62_v23  ;;  %v1080_v11 = vrot.slane %v1016_v33, %v253_v8 }
  0x29   :  { %310 = vrot.lane.b32.xlu1 %v929_v22, %s850_s2 }
  0x2a   :  { %306 = vrot.lane.b32.xlu0 %v934_v24, %s850_s2 }
  0x2d   :  { %273 = vrot.lane.b32.xlu1 %v934_v24, %s851_s6 }
  0x2e   :  { %271 = vrot.lane.b32.xlu0 %v924_v20, %s851_s6 }
  0x31   :  { %277 = vrot.lane.b32.xlu1 %v929_v22, %s851_s6 }
  0x32   :  { %275 = vrot.lane.b32.xlu0 %v921_v17, %s851_s6 }
  0x35   :  { %240 = vrot.lane.b32.xlu1 %v934_v24, %s852_s7 }
  0x36   :  { %238 = vrot.lane.b32.xlu0 %v924_v20, %s852_s7 }
  0x39   :  { %244 = vrot.lane.b32.xlu1 %v929_v22, %s852_s7 }
  0x3a   :  { %242 = vrot.lane.b32.xlu0 %v921_v17, %s852_s7 }
  0x3d   :  { %207 = vrot.lane.b32.xlu1 %v934_v24, %s853_s8 }
  0x3e   :  { %205 = vrot.lane.b32.xlu0 %v924_v20, %s853_s8 }
  0x41   :  { %211 = vrot.lane.b32.xlu1 %v929_v22, %s853_s8 }
  0x42   :  { %209 = vrot.lane.b32.xlu0 %v921_v17, %s853_s8 }
  0x45   :  { %174 = vrot.lane.b32.xlu1 %v934_v24, %s854_s9 }
  0x46   :  { %172 = vrot.lane.b32.xlu0 %v924_v20, %s854_s9 }
  0x49   :  { %178 = vrot.lane.b32.xlu1 %v929_v22, %s854_s9 }
  0x4a   :  { %176 = vrot.lane.b32.xlu0 %v921_v17, %s854_s9 }
  0x4d   :  { %141 = vrot.lane.b32.xlu1 %v934_v24, %s855_s10 }
  0x4e   :  { %139 = vrot.lane.b32.xlu0 %v924_v20, %s855_s10 }
  0x51   :  { %145 = vrot.lane.b32.xlu1 %v929_v22, %s855_s10 }
  0x52   :  { %143 = vrot.lane.b32.xlu0 %v921_v17, %s855_s10 }
  0x55   :  { %108 = vrot.lane.b32.xlu1 %v934_v24, %s856_s11 }
  0x56   :  { %106 = vrot.lane.b32.xlu0 %v924_v20, %s856_s11 }
  0x59   :  { %112 = vrot.lane.b32.xlu1 %v929_v22, %s856_s11 }
  0x5a   :  { %110 = vrot.lane.b32.xlu0 %v921_v17, %s856_s11 }
  0x5d   :  { %73 = vrot.lane.b32.xlu1 %v934_v24, %s858_s12 }
  0x5e   :  { %71 = vrot.lane.b32.xlu0 %v924_v20, %s858_s12 }
  0x61   :  { %77 = vrot.lane.b32.xlu1 %v929_v22, %s858_s12 }
  0x62   :  { %75 = vrot.lane.b32.xlu0 %v921_v17, %s858_s12 }
  0x97   :  { %v309_v32 = vpop.permute.xlu1 %308 }
  0x98   :  { %v305_v35 = vpop.permute.xlu0 %304 }
  0x9b   :  { %v311_v40 = vpop.permute.xlu1 %310 }
  0x9c   :  { %v313_v41 = vsel %vm312_vm4, %v309_v32, %v311_v40  ;;  %v307_v42 = vpop.permute.xlu0 %306  ;;  %v316_v43 = vsel %vm312_vm4, %v311_v40, %v305_v35  ;;  %v220_v40 = vsub.s32 4, %v998_v27 }
  0x9d   :  { %v315_v44 = vsel %vm312_vm4, %v305_v35, %v307_v42  ;;  %v314_v45 = vsel %vm312_vm4, %v307_v42, %v309_v32  ;;  %v336_v46 = vmul.f32 %v1025_v36, %v316_v43  ;;  %v335_v47 = vmul.f32 %v1028_v37, %v313_v41 }
  0x9e   :  { %v334_v48 = vmul.f32 %v1031_v38, %v314_v45  ;;  %v333_v49 = vmul.f32 %v1034_v39, %v315_v44  ;;  %v1103_v42 = vrot.slane %v1006_v30, %v220_v40  ;;  %v1106_v43 = vrot.slane %v1016_v33, %v220_v40 }
  0x9f   :  { %v274_v50 = vpop.permute.xlu1 %273  ;;  %427 = vmatprep.subr.mxu1 %v336_v46  ;;  %v1109_v44 = vrot.slane %v1011_v31, %v220_v40  ;;  %v187_v45 = vsub.s32 3, %v998_v27  ;;  %v1113_v46 = vrot.slane %v1021_v34, %v220_v40 }
  0xa0   :  { %356 = vmatprep.subr.mxu0 %v334_v48  ;;  %v272_v52 = vpop.permute.xlu0 %271  ;;  %428 = vmatpush1.msra.mxu1 %v335_v47 }
  0xa1   :  { %357 = vmatpush1.msra.mxu0 %v333_v49  ;;  %v282_v58 = vsel %vm279_vm5, %v272_v52, %v274_v50  ;;  %v1143_v8 = vrot.slane %v1006_v30, %v187_v45 }
  0xa2   :  { %v300_v5 = vmul.f32 %v1060_v56, %v282_v58 }
  0xa3   :  { %v278_v57 = vpop.permute.xlu1 %277 }
  0xa4   :  { %v283_v59 = vsel %vm279_vm5, %v278_v57, %v272_v52  ;;  %v276_v60 = vpop.permute.xlu0 %275 }
  0xa5   :  { %v303_v61 = vmul.f32 %v1051_v53, %v283_v59  ;;  %v280_v62 = vsel %vm279_vm5, %v276_v60, %v278_v57  ;;  %v281_v63 = vsel %vm279_vm5, %v274_v50, %v276_v60  ;;  %v1128_v60 = vrot.slane %v1016_v33, %v187_v45 }
  0xa6   :  { %v301_v3 = vmul.f32 %v1054_v54, %v281_v63  ;;  %v302_v4 = vmul.f32 %v1057_v55, %v280_v62 }
  0xa7   :  { %v241_v7 = vpop.permute.xlu1 %240  ;;  %429 = vmatprep.subr.mxu1 %v303_v61 }
  0xa8   :  { %358 = vmatprep.subr.mxu0 %v301_v3  ;;  %v239_v9 = vpop.permute.xlu0 %238  ;;  %430 = vmatpush1.msra.mxu1 %v302_v4  ;;  %v1134_v4 = vrot.slane %v1021_v34, %v187_v45 }
  0xa9   :  { %359 = vmatpush1.msra.mxu0 %v300_v5  ;;  %v249_v15 = vsel %vm246_vm6, %v239_v9, %v241_v7 }
  0xaa   :  { %v267_v32 = vmul.f32 %v1086_v13, %v249_v15 }
  0xab   :  { %v245_v14 = vpop.permute.xlu1 %244 }
  0xac   :  { %v250_v16 = vsel %vm246_vm6, %v245_v14, %v239_v9  ;;  %v243_v18 = vpop.permute.xlu0 %242  ;;  %v154_v9 = vsub.s32 2, %v998_v27 }
  0xad   :  { %v270_v19 = vmul.f32 %v1077_v10, %v250_v16  ;;  %v247_v21 = vsel %vm246_vm6, %v243_v18, %v245_v14  ;;  %v248_v23 = vsel %vm246_vm6, %v241_v7, %v243_v18  ;;  %v1140_v7 = vrot.slane %v1011_v31, %v187_v45 }
  0xae   :  { %v268_v26 = vmul.f32 %v1080_v11, %v248_v23  ;;  %v269_v29 = vmul.f32 %v1083_v12, %v247_v21  ;;  %v1171_v40 = vrot.slane %v1006_v30, %v154_v9 }
  0xaf   :  { %v208_v35 = vpop.permute.xlu1 %207  ;;  %431 = vmatprep.subr.mxu1 %v270_v19 }
  0xb0   :  { %360 = vmatprep.subr.mxu0 %v268_v26  ;;  %v206_v41 = vpop.permute.xlu0 %205  ;;  %432 = vmatpush1.msra.mxu1 %v269_v29  ;;  %v1164_v29 = vrot.slane %v1021_v34, %v154_v9 }
  0xb1   :  { %361 = vmatpush1.msra.mxu0 %v267_v32  ;;  %v216_v48 = vsel %vm213_vm7, %v206_v41, %v208_v35 }
  0xb2   :  { %v234_v61 = vmul.f32 %v1113_v46, %v216_v48 }
  0xb3   :  { %v212_v47 = vpop.permute.xlu1 %211 }
  0xb4   :  { %v217_v49 = vsel %vm213_vm7, %v212_v47, %v206_v41  ;;  %v210_v50 = vpop.permute.xlu0 %209  ;;  %v121_v41 = vsub.s32 1, %v998_v27 }
  0xb5   :  { %v237_v51 = vmul.f32 %v1103_v42, %v217_v49  ;;  %v214_v52 = vsel %vm213_vm7, %v210_v50, %v212_v47  ;;  %v215_v57 = vsel %vm213_vm7, %v208_v35, %v210_v50  ;;  %v1168_v35 = vrot.slane %v1011_v31, %v154_v9 }
  0xb6   :  { %v235_v58 = vmul.f32 %v1106_v43, %v215_v57  ;;  %v236_v59 = vmul.f32 %v1109_v44, %v214_v52 }
  0xb7   :  { %v175_v62 = vpop.permute.xlu1 %174  ;;  %433 = vmatprep.subr.mxu1 %v237_v51 }
  0xb8   :  { %362 = vmatprep.subr.mxu0 %v235_v58  ;;  %v173_v63 = vpop.permute.xlu0 %172  ;;  %434 = vmatpush1.msra.mxu1 %v236_v59  ;;  %v1185_v58 = vrot.slane %v1016_v33, %v121_v41 }
  0xb9   :  { %v183_v3 = vsel %vm180_vm8, %v173_v63, %v175_v62  ;;  %363 = vmatpush1.msra.mxu0 %v234_v61  ;;  %435 = vmatprep.subr.mxu1 %v929_v22 }
  0xba   :  { %v202_v5 = vmul.f32 %v1128_v60, %v183_v3  ;;  %364 = vmatprep.subr.mxu0 %v934_v24  ;;  %436 = vmatpush1.msra.mxu1 %v921_v17 }
  0xbb   :  { %365 = vmatpush1.msra.mxu0 %v924_v20  ;;  %v179_v14 = vpop.permute.xlu1 %178  ;;  %v1159_v20 = vrot.slane %v1016_v33, %v154_v9  ;;  %v1197_v9 = vrot.slane %v1006_v30, %v121_v41 }
  0xbc   :  { %v184_v22 = vsel %vm180_vm8, %v179_v14, %v173_v63  ;;  %366 = vmatprep.subr.mxu0 %v202_v5  ;;  %v177_v15 = vpop.permute.xlu0 %176  ;;  %v1190_v63 = vrot.slane %v1021_v34, %v121_v41  ;;  %v1194_v5 = vrot.slane %v1011_v31, %v121_v41 }
  0xbd   :  { %v201_v24 = vmul.f32 %v1134_v4, %v184_v22  ;;  %v181_v16 = vsel %vm180_vm8, %v177_v15, %v179_v14  ;;  %v182_v18 = vsel %vm180_vm8, %v175_v62, %v177_v15  ;;  %v88_v14 = vsub.s32 0, %v998_v27 }
  0xbe   :  { %v203_v17 = vmul.f32 %v1140_v7, %v182_v18  ;;  %v204_v19 = vmul.f32 %v1143_v8, %v181_v16 }
  0xbf   :  { %v142_v21 = vpop.permute.xlu1 %141  ;;  %367 = vmatpush1.msra.mxu0 %v201_v24  ;;  %v1211_v27 = vrot.slane %v1016_v33, %v88_v14  ;;  %v1216_v41 = vrot.slane %v1021_v34, %v88_v14 }
  0xc0   :  { %437 = vmatprep.subr.mxu1 %v204_v19  ;;  %v140_v23 = vpop.permute.xlu0 %139 }
  0xc1   :  { %v150_v26 = vsel %vm147_vm9, %v140_v23, %v142_v21  ;;  %438 = vmatpush1.msra.mxu1 %v203_v17 }
  0xc2   :  { %v169_v32 = vmul.f32 %v1159_v20, %v150_v26 }
  0xc3   :  { %v146_v45 = vpop.permute.xlu1 %145 }
  0xc4   :  { %v151_v47 = vsel %vm147_vm9, %v146_v45, %v140_v23  ;;  %368 = vmatprep.subr.mxu0 %v169_v32  ;;  %v144_v48 = vpop.permute.xlu0 %143 }
  0xc5   :  { %v168_v49 = vmul.f32 %v1164_v29, %v151_v47  ;;  %v148_v50 = vsel %vm147_vm9, %v144_v48, %v146_v45  ;;  %v149_v51 = vsel %vm147_vm9, %v142_v21, %v144_v48  ;;  %v1220_v47 = vrot.slane %v1011_v31, %v88_v14  ;;  %v70_v31 = vld [vmem:[%s1433_s3] sm:$0xff]  ;;  %s794_s3 = sld [smem:[#allocation2 + $0x1]] }
  0xc6   :  { %v170_v52 = vmul.f32 %v1168_v35, %v149_v51  ;;  %v171_v57 = vmul.f32 %v1171_v40, %v148_v50  ;;  %v1223_v48 = vrot.slane %v1006_v30, %v88_v14 }
  0xc7   :  { %v109_v59 = vpop.permute.xlu1 %108  ;;  %369 = vmatpush1.msra.mxu0 %v168_v49 }
  0xc8   :  { %439 = vmatprep.subr.mxu1 %v171_v57  ;;  %v107_v61 = vpop.permute.xlu0 %106 }
  0xc9   :  { %v117_v62 = vsel %vm114_vm10, %v107_v61, %v109_v59  ;;  %440 = vmatpush1.msra.mxu1 %v170_v52 }
  0xca   :  { %v136_v3 = vmul.f32 %v1185_v58, %v117_v62 }
  0xcb   :  { %v113_v22 = vpop.permute.xlu1 %112 }
  0xcc   :  { %v118_v15 = vsel %vm114_vm10, %v113_v22, %v107_v61  ;;  %370 = vmatprep.subr.mxu0 %v136_v3  ;;  %v111_v24 = vpop.permute.xlu0 %110 }
  0xcd   :  { %v135_v16 = vmul.f32 %v1190_v63, %v118_v15  ;;  %v115_v18 = vsel %vm114_vm10, %v111_v24, %v113_v22  ;;  %v116_v17 = vsel %vm114_vm10, %v109_v59, %v111_v24  ;;  %v337_v59 = vstv %s794_s3 }
  0xce   :  { %v137_v19 = vmul.f32 %v1194_v5, %v116_v17  ;;  %v138_v21 = vmul.f32 %v1197_v9, %v115_v18  ;;  %v504_v17 = vstv %s795_s22 }
  0xcf   :  { %v74_v23 = vpop.permute.xlu1 %73  ;;  %371 = vmatpush1.msra.mxu0 %v135_v16 }
  0xd0   :  { %441 = vmatprep.subr.mxu1 %v138_v21  ;;  %v72_v26 = vpop.permute.xlu0 %71 }
  0xd1   :  { %v84_v32 = vsel %vm81_vm11, %v72_v26, %v74_v23  ;;  %442 = vmatpush1.msra.mxu1 %v137_v19 }
  0xd2   :  { %v103_v45 = vmul.f32 %v1211_v27, %v84_v32 }
  0xd3   :  { %v78_v33 = vpop.permute.xlu1 %77 }
  0xd4   :  { %v85_v49 = vsel %vm81_vm11, %v78_v33, %v72_v26  ;;  %372 = vmatprep.subr.mxu0 %v103_v45  ;;  %v76_v50 = vpop.permute.xlu0 %75 }
  0xd5   :  { %v102_v51 = vmul.f32 %v1216_v41, %v85_v49  ;;  %v82_v34 = vsel %vm81_vm11, %v76_v50, %v78_v33  ;;  %v83_v52 = vsel %vm81_vm11, %v74_v23, %v76_v50 }
  0xd6   :  { %v104_v30 = vmul.f32 %v1220_v47, %v83_v52  ;;  %v105_v57 = vmul.f32 %v1223_v48, %v82_v34 }
  0xd7   :  { %373 = vmatpush1.msra.mxu0 %v102_v51 }
  0xd8   :  { %443 = vmatprep.subr.mxu1 %v105_v57  ;;  %801 = vmatmul.mubr.msk.f32.vlgmr.msra.gmra.mxu0 %vm338_vm12, %v70_v31 }
  0xd9   :  { %444 = vmatpush1.msra.mxu1 %v104_v30  ;;  %655 = vmatprep.subr.mxu0 %v913_v6 }
  0xda   :  { %802 = vmatmul.mubr.msk.f32.vlgmr.msra.gmra.mxu1 %vm338_vm12, %v70_v31  ;;  %656 = vmatpush1.msra.mxu0 %v900_v1 }
  0xdb   :  { %726 = vmatprep.subr.mxu1 %v905_v2  ;;  %707 = vmatprep.mubr.f32.mxu0 %v857_v25 }
  0xdc   :  { %727 = vmatpush1.msra.mxu1 %v895_v0  ;;  %778 = vmatprep.mubr.f32.mxu1 %v857_v25 }
 0x198   :  { %v408_v61 = vpop.f32.mrf.mxu0 }
 0x199   :  { %v409_v62 = vadd.f32 %v408_v61, %v337_v59 }
 0x19a   :  { %v479_v3 = vpop.f32.mrf.mxu1  ;;  %v410_v14 = vpop.f32.mrf.mxu0 }
 0x19b   :  { %v488_v22 = vmul.f32 1.442695, %v409_v62  ;;  %v480_v15 = vadd.f32 %v479_v3, %v337_v59  ;;  %v411_v6 = vadd.f32 %v410_v14, %v337_v59  ;;  %vm484_vm13 = vcmp.gt.f32.partialorder %v409_v62, 0.0 }
 0x19c   :  { %v481_v24 = vpop.f32.mrf.mxu1 }
 0x19d   :  { %827 = vpow2.f32 %v488_v22  ;;  %v492_v1 = vmul.f32 1.442695, %v480_v15  ;;  %v490_v16 = vmul.f32 1.442695, %v411_v6  ;;  %v482_v2 = vadd.f32 %v481_v24, %v337_v59 }
 0x19e   :  { %vm486_vm14 = vcmp.gt.f32.partialorder %v480_v15, 0.0  ;;  %vm485_vm15 = vcmp.gt.f32.partialorder %v411_v6, 0.0 }
 0x19f   :  { %829 = vpow2.f32 %v492_v1  ;;  %v494_v18 = vmul.f32 1.442695, %v482_v2  ;;  %vm487_vm0 = vcmp.gt.f32.partialorder %v482_v2, 0.0 }
 0x1a0   :  { %831 = vpow2.f32 %v490_v16 }
 0x1a1   :  { %833 = vpow2.f32 %v494_v18 }
 0x1aa   :  { %v828_v0 = vpop.eup %827 }
 0x1ab   :  { %v803_v25 = vadd.f32 -1.0, %v828_v0 }
 0x1ac   :  { %v830_v19 = vpop.eup %829 }
 0x1ad   :  { %v832_v21 = vpop.eup %831  ;;  %v500_v23 = vsel %vm484_vm13, %v409_v62, %v803_v25  ;;  %v805_v26 = vadd.f32 -1.0, %v830_v19 }
 0x1ae   :  { %v1243_v32 = vadd.f32 %v504_v17, %v500_v23  ;;  %v804_v45 = vadd.f32 -1.0, %v832_v21  ;;  %v834_v33 = vpop.eup %833 }
 0x1af   :  { %v502_v49 = vsel %vm486_vm14, %v480_v15, %v805_v26  ;;  %v806_v51 = vadd.f32 -1.0, %v834_v33 }
 0x1b0   :  { %v501_v50 = vsel %vm485_vm15, %v411_v6, %v804_v45  ;;  %621 = vrot.lane.b32.xlu0 %v1243_v32, %s850_s2  ;;  %v1249_v52 = vadd.f32 %v504_v17, %v502_v49 }
 0x1b1   :  { %v1247_v34 = vadd.f32 %v504_v17, %v501_v50  ;;  %v503_v31 = vsel %vm487_vm0, %v482_v2, %v806_v51 }
 0x1b2   :  { %v1255_v30 = vadd.f32 %v504_v17, %v503_v31 }
 0x1b3   :  { %623 = vrot.lane.b32.xlu1 %v1247_v34, %s850_s2 }
 0x1b4   :  { %625 = vrot.lane.b32.xlu0 %v1249_v52, %s850_s2 }
 0x1b7   :  { %627 = vrot.lane.b32.xlu1 %v1255_v30, %s850_s2 }
 0x1b8   :  { %605 = vrot.lane.b32.xlu0 %v1243_v32, %s851_s6 }
 0x1bb   :  { %607 = vrot.lane.b32.xlu1 %v1247_v34, %s851_s6 }
 0x1bc   :  { %609 = vrot.lane.b32.xlu0 %v1249_v52, %s851_s6 }
 0x1bf   :  { %611 = vrot.lane.b32.xlu1 %v1255_v30, %s851_s6 }
 0x1c0   :  { %589 = vrot.lane.b32.xlu0 %v1243_v32, %s852_s7 }
 0x1c3   :  { %591 = vrot.lane.b32.xlu1 %v1247_v34, %s852_s7 }
 0x1c4   :  { %593 = vrot.lane.b32.xlu0 %v1249_v52, %s852_s7 }
 0x1c7   :  { %595 = vrot.lane.b32.xlu1 %v1255_v30, %s852_s7 }
 0x1c8   :  { %573 = vrot.lane.b32.xlu0 %v1243_v32, %s853_s8 }
 0x1cb   :  { %575 = vrot.lane.b32.xlu1 %v1247_v34, %s853_s8 }
 0x1cc   :  { %577 = vrot.lane.b32.xlu0 %v1249_v52, %s853_s8 }
 0x1cf   :  { %579 = vrot.lane.b32.xlu1 %v1255_v30, %s853_s8 }
 0x1d0   :  { %557 = vrot.lane.b32.xlu0 %v1243_v32, %s854_s9 }
 0x1d3   :  { %559 = vrot.lane.b32.xlu1 %v1247_v34, %s854_s9 }
 0x1d4   :  { %561 = vrot.lane.b32.xlu0 %v1249_v52, %s854_s9 }
 0x1d7   :  { %563 = vrot.lane.b32.xlu1 %v1255_v30, %s854_s9 }
 0x1d8   :  { %541 = vrot.lane.b32.xlu0 %v1243_v32, %s855_s10 }
 0x1db   :  { %543 = vrot.lane.b32.xlu1 %v1247_v34, %s855_s10 }
 0x1dc   :  { %545 = vrot.lane.b32.xlu0 %v1249_v52, %s855_s10 }
 0x1df   :  { %547 = vrot.lane.b32.xlu1 %v1255_v30, %s855_s10 }
 0x1e0   :  { %525 = vrot.lane.b32.xlu0 %v1243_v32, %s856_s11 }
 0x1e3   :  { %527 = vrot.lane.b32.xlu1 %v1247_v34, %s856_s11 }
 0x1e4   :  { %529 = vrot.lane.b32.xlu0 %v1249_v52, %s856_s11 }
 0x1e7   :  { %531 = vrot.lane.b32.xlu1 %v1255_v30, %s856_s11 }
 0x1e8   :  { %509 = vrot.lane.b32.xlu0 %v1243_v32, %s858_s12 }
 0x1eb   :  { %511 = vrot.lane.b32.xlu1 %v1247_v34, %s858_s12 }
 0x1ec   :  { %513 = vrot.lane.b32.xlu0 %v1249_v52, %s858_s12 }
 0x1ef   :  { %515 = vrot.lane.b32.xlu1 %v1255_v30, %s858_s12 }
 0x222   :  { %v622_v57 = vpop.permute.xlu0 %621 }
 0x225   :  { %v624_v59 = vpop.permute.xlu1 %623 }
 0x226   :  { %v631_v61 = vsel %vm312_vm4, %v622_v57, %v624_v59  ;;  %v626_v62 = vpop.permute.xlu0 %625 }
 0x227   :  { %v630_v3 = vsel %vm312_vm4, %v624_v59, %v626_v62  ;;  %v633_v22 = vmul.f32 %v631_v61, %v1034_v39 }
 0x228   :  { %v634_v14 = vmul.f32 %v630_v3, %v1031_v38 }
 0x229   :  { %v628_v15 = vpop.permute.xlu1 %627 }
 0x22a   :  { %v629_v6 = vsel %vm312_vm4, %v626_v62, %v628_v15  ;;  %v632_v24 = vsel %vm312_vm4, %v628_v15, %v622_v57  ;;  %657 = vmatprep.subr.mxu0 %v634_v14  ;;  %v606_v1 = vpop.permute.xlu0 %605 }
 0x22b   :  { %v635_v16 = vmul.f32 %v629_v6, %v1028_v37  ;;  %v636_v2 = vmul.f32 %v632_v24, %v1025_v36  ;;  %658 = vmatpush1.msra.mxu0 %v633_v22 }
 0x22d   :  { %v608_v18 = vpop.permute.xlu1 %607  ;;  %728 = vmatprep.subr.mxu1 %v636_v2 }
 0x22e   :  { %v615_v38 = vsel %vm279_vm5, %v606_v1, %v608_v18  ;;  %729 = vmatpush1.msra.mxu1 %v635_v16  ;;  %v610_v39 = vpop.permute.xlu0 %609 }
 0x22f   :  { %v614_v0 = vsel %vm279_vm5, %v608_v18, %v610_v39  ;;  %v617_v17 = vmul.f32 %v615_v38, %v1060_v56 }
 0x230   :  { %v618_v25 = vmul.f32 %v614_v0, %v1054_v54 }
 0x231   :  { %v612_v19 = vpop.permute.xlu1 %611 }
 0x232   :  { %v613_v37 = vsel %vm279_vm5, %v610_v39, %v612_v19  ;;  %v616_v36 = vsel %vm279_vm5, %v612_v19, %v606_v1  ;;  %659 = vmatprep.subr.mxu0 %v618_v25  ;;  %v590_v21 = vpop.permute.xlu0 %589 }
 0x233   :  { %v619_v23 = vmul.f32 %v613_v37, %v1057_v55  ;;  %v620_v26 = vmul.f32 %v616_v36, %v1051_v53  ;;  %660 = vmatpush1.msra.mxu0 %v617_v17 }
 0x235   :  { %v592_v45 = vpop.permute.xlu1 %591  ;;  %730 = vmatprep.subr.mxu1 %v620_v26 }
 0x236   :  { %v599_v54 = vsel %vm246_vm6, %v590_v21, %v592_v45  ;;  %731 = vmatpush1.msra.mxu1 %v619_v23  ;;  %v594_v56 = vpop.permute.xlu0 %593 }
 0x237   :  { %v598_v33 = vsel %vm246_vm6, %v592_v45, %v594_v56  ;;  %v601_v50 = vmul.f32 %v599_v54, %v1086_v13 }
 0x238   :  { %v602_v49 = vmul.f32 %v598_v33, %v1080_v11 }
 0x239   :  { %v596_v51 = vpop.permute.xlu1 %595 }
 0x23a   :  { %v597_v55 = vsel %vm246_vm6, %v594_v56, %v596_v51  ;;  %v600_v53 = vsel %vm246_vm6, %v596_v51, %v590_v21  ;;  %661 = vmatprep.subr.mxu0 %v602_v49  ;;  %v574_v31 = vpop.permute.xlu0 %573 }
 0x23b   :  { %v603_v57 = vmul.f32 %v597_v55, %v1083_v12  ;;  %v604_v59 = vmul.f32 %v600_v53, %v1077_v10  ;;  %662 = vmatpush1.msra.mxu0 %v601_v50 }
 0x23d   :  { %v576_v61 = vpop.permute.xlu1 %575  ;;  %732 = vmatprep.subr.mxu1 %v604_v59  ;;  %v637_v59 = vld [vmem:[%s1434_s4] sm:$0xff] }
 0x23e   :  { %v583_v11 = vsel %vm213_vm7, %v574_v31, %v576_v61  ;;  %733 = vmatpush1.msra.mxu1 %v603_v57  ;;  %v578_v13 = vpop.permute.xlu0 %577 }
 0x23f   :  { %v582_v62 = vsel %vm213_vm7, %v576_v61, %v578_v13  ;;  %v585_v14 = vmul.f32 %v583_v11, %v1113_v46  ;;  %v638_v61 = vstv %s796_s25 }
 0x240   :  { %v586_v3 = vmul.f32 %v582_v62, %v1106_v43 }
 0x241   :  { %v580_v22 = vpop.permute.xlu1 %579 }
 0x242   :  { %v581_v12 = vsel %vm213_vm7, %v578_v13, %v580_v22  ;;  %v584_v10 = vsel %vm213_vm7, %v580_v22, %v574_v31  ;;  %663 = vmatprep.subr.mxu0 %v586_v3  ;;  %v558_v15 = vpop.permute.xlu0 %557 }
 0x243   :  { %v587_v6 = vmul.f32 %v581_v12, %v1109_v44  ;;  %v588_v24 = vmul.f32 %v584_v10, %v1103_v42  ;;  %664 = vmatpush1.msra.mxu0 %v585_v14 }
 0x244   :  { %665 = vmatprep.subr.mxu0 %v1247_v34 }
 0x245   :  { %v560_v1 = vpop.permute.xlu1 %559  ;;  %734 = vmatprep.subr.mxu1 %v588_v24  ;;  %666 = vmatpush1.msra.mxu0 %v1243_v32 }
 0x246   :  { %v567_v43 = vsel %vm180_vm8, %v558_v15, %v560_v1  ;;  %735 = vmatpush1.msra.mxu1 %v587_v6  ;;  %v562_v46 = vpop.permute.xlu0 %561 }
 0x247   :  { %v570_v16 = vmul.f32 %v567_v43, %v1128_v60  ;;  %736 = vmatprep.subr.mxu1 %v1255_v30  ;;  %v566_v42 = vsel %vm180_vm8, %v560_v1, %v562_v46 }
 0x248   :  { %737 = vmatpush1.msra.mxu1 %v1249_v52  ;;  %v571_v30 = vmul.f32 %v566_v42, %v1140_v7 }
 0x249   :  { %v564_v44 = vpop.permute.xlu1 %563  ;;  %667 = vmatprep.subr.mxu0 %v570_v16 }
 0x24a   :  { %v565_v34 = vsel %vm180_vm8, %v562_v46, %v564_v44  ;;  %v568_v32 = vsel %vm180_vm8, %v564_v44, %v558_v15  ;;  %v542_v2 = vpop.permute.xlu0 %541 }
 0x24b   :  { %v569_v18 = vmul.f32 %v568_v32, %v1134_v4  ;;  %v572_v60 = vmul.f32 %v565_v34, %v1143_v8 }
 0x24d   :  { %v544_v38 = vpop.permute.xlu1 %543  ;;  %668 = vmatpush1.msra.mxu0 %v569_v18  ;;  %738 = vmatprep.subr.mxu1 %v572_v60 }
 0x24e   :  { %v551_v52 = vsel %vm147_vm9, %v542_v2, %v544_v38  ;;  %739 = vmatpush1.msra.mxu1 %v571_v30  ;;  %v546_v39 = vpop.permute.xlu0 %545 }
 0x24f   :  { %v554_v0 = vmul.f32 %v551_v52, %v1159_v20  ;;  %v550_v25 = vsel %vm147_vm9, %v544_v38, %v546_v39 }
 0x250   :  { %v555_v36 = vmul.f32 %v550_v25, %v1168_v35 }
 0x251   :  { %v548_v17 = vpop.permute.xlu1 %547  ;;  %669 = vmatprep.subr.mxu0 %v554_v0 }
 0x252   :  { %v549_v4 = vsel %vm147_vm9, %v546_v39, %v548_v17  ;;  %v552_v7 = vsel %vm147_vm9, %v548_v17, %v542_v2  ;;  %v526_v8 = vpop.permute.xlu0 %525 }
 0x253   :  { %v553_v19 = vmul.f32 %v552_v7, %v1164_v29  ;;  %v556_v37 = vmul.f32 %v549_v4, %v1171_v40 }
 0x255   :  { %v528_v21 = vpop.permute.xlu1 %527  ;;  %670 = vmatpush1.msra.mxu0 %v553_v19  ;;  %740 = vmatprep.subr.mxu1 %v556_v37 }
 0x256   :  { %v535_v20 = vsel %vm114_vm10, %v526_v8, %v528_v21  ;;  %741 = vmatpush1.msra.mxu1 %v555_v36  ;;  %v530_v23 = vpop.permute.xlu0 %529 }
 0x257   :  { %v538_v26 = vmul.f32 %v535_v20, %v1185_v58  ;;  %v534_v45 = vsel %vm114_vm10, %v528_v21, %v530_v23 }
 0x258   :  { %v539_v49 = vmul.f32 %v534_v45, %v1194_v5 }
 0x259   :  { %v532_v54 = vpop.permute.xlu1 %531  ;;  %671 = vmatprep.subr.mxu0 %v538_v26 }
 0x25a   :  { %v533_v29 = vsel %vm114_vm10, %v530_v23, %v532_v54  ;;  %v536_v35 = vsel %vm114_vm10, %v532_v54, %v526_v8  ;;  %v510_v40 = vpop.permute.xlu0 %509 }
 0x25b   :  { %v537_v56 = vmul.f32 %v536_v35, %v1190_v63  ;;  %v540_v33 = vmul.f32 %v533_v29, %v1197_v9 }
 0x25d   :  { %v512_v50 = vpop.permute.xlu1 %511  ;;  %672 = vmatpush1.msra.mxu0 %v537_v56  ;;  %742 = vmatprep.subr.mxu1 %v540_v33 }
 0x25e   :  { %v519_v58 = vsel %vm81_vm11, %v510_v40, %v512_v50  ;;  %743 = vmatpush1.msra.mxu1 %v539_v49  ;;  %v514_v51 = vpop.permute.xlu0 %513 }
 0x25f   :  { %v522_v55 = vmul.f32 %v519_v58, %v1211_v27  ;;  %v518_v53 = vsel %vm81_vm11, %v512_v50, %v514_v51 }
 0x260   :  { %v523_v27 = vmul.f32 %v518_v53, %v1220_v47 }
 0x261   :  { %v516_v31 = vpop.permute.xlu1 %515  ;;  %673 = vmatprep.subr.mxu0 %v522_v55 }
 0x262   :  { %v517_v63 = vsel %vm81_vm11, %v514_v51, %v516_v31  ;;  %v520_v5 = vsel %vm81_vm11, %v516_v31, %v510_v40 }
 0x263   :  { %v521_v9 = vmul.f32 %v520_v5, %v1216_v41  ;;  %v524_v57 = vmul.f32 %v517_v63, %v1223_v48 }
 0x265   :  { %674 = vmatpush1.msra.mxu0 %v521_v9  ;;  %744 = vmatprep.subr.mxu1 %v524_v57 }
 0x266   :  { %807 = vmatmul.mubr.msk.f32.vlgmr.msra.gmra.mxu0 %vm639_vm1, %v637_v59  ;;  %745 = vmatpush1.msra.mxu1 %v523_v27 }
 0x267   :  { %808 = vmatmul.mubr.msk.f32.vlgmr.msra.gmra.mxu1 %vm639_vm1, %v637_v59 }
 0x326   :  { %v709_v28 = vpop.f32.mrf.mxu0 }
 0x327   :  { %v710_v11 = vadd.f32 %v709_v28, %v638_v61  ;;  %v780_v13 = vpop.f32.mrf.mxu1 }
 0x328   :  { %v781_v41 = vadd.f32 %v780_v13, %v638_v61  ;;  %v711_v62 = vpop.f32.mrf.mxu0 }
 0x329   :  { %785 = vst [vmem:[%s1435_s5] sm:$0xff] %v710_v11  ;;  %v712_v48 = vadd.f32 %v711_v62, %v638_v61  ;;  %v782_v3 = vpop.f32.mrf.mxu1 }
 0x32a   :  { %787 = vst [vmem:[%s1435_s5 + $0x10] sm:$0xff] %v781_v41  ;;  %v783_v47 = vadd.f32 %v782_v3, %v638_v61 }
 0x32b   :  { %786 = vst [vmem:[%s1435_s5 + $0x8] sm:$0xff] %v712_v48 }
 0x32c   :  { %788 = vst [vmem:[%s1435_s5 + $0x18] sm:$0xff] %v783_v47 }
 0x32d   :  { %793 = vsyncpa [#allocation3], 1 }

</bundles_post_ra>
